<compile_context>
chip_gen: v5e
topology: v5e:2x2
jax: 0.10.0
libtpu: 0.0.40
codegen_flags: <defaults>
</compile_context>

<pallas_src>
import math

import jax
import jax.numpy as jnp
from jax.experimental import pallas as pl
from jax.experimental.pallas import tpu as pltpu


def _to_3tuple(v):
    return tuple(v) if isinstance(v, (tuple, list)) else (v, v, v)


def _get_pad_shape(input_shape, kernel_size, stride, dilation):
    """Same arithmetic as AdaptivePadding.get_pad_shape (static Python ints)."""
    t, h, w = input_shape
    kd, kh, kw = kernel_size
    sd, sh, sw = stride
    dd, dh, dw = dilation
    od, oh, ow = math.ceil(t / sd), math.ceil(h / sh), math.ceil(w / sw)
    pad_d = max((od - 1) * sd + (kd - 1) * dd + 1 - t, 0)
    pad_h = max((oh - 1) * sh + (kh - 1) * dh + 1 - h, 0)
    pad_w = max((ow - 1) * sw + (kw - 1) * dw + 1 - w, 0)
    return pad_d, pad_h, pad_w


def _hw_budget():
    """Generation-aware (tile_budget_bytes, vmem_limit_bytes, assumed #TCs)."""
    try:
        cap = int(pltpu.get_tpu_info().vmem_capacity_bytes)
    except Exception:
        cap = 64 * 1024 * 1024  # conservative default (v7x-sized VMEM)
    if cap >= 100 * 1024 * 1024:
        # 128 MiB parts (v5e / v6e): single TensorCore -> biggest blocks win.
        return 48 << 20, 96 << 20, 1
    # 64 MiB part (v7x): smaller per-step footprint, 2 TensorCores.
    return 16 << 20, 32 << 20, 2


def _xla_pad(x, fronts, backs):
    cfg = ((0, 0), (0, 0)) + tuple((f, b) for f, b in zip(fronts, backs))
    return jnp.pad(x, cfg)


def adaptive_padding(x, kernel_size=1, stride=1, dilation=1, padding="corner"):
    """Adaptive zero-padding of x (B, C, T, H, W) so a conv with the given
    kernel/stride/dilation fully covers the input ('corner' or 'same')."""
    assert padding in ("same", "corner")
    ks, st, dl = _to_3tuple(kernel_size), _to_3tuple(stride), _to_3tuple(dilation)

    B, C, T, H, W = x.shape
    pad_d, pad_h, pad_w = _get_pad_shape((T, H, W), ks, st, dl)
    if pad_d == 0 and pad_h == 0 and pad_w == 0:
        return x

    if padding == "corner":
        fronts = (0, 0, 0)
    else:  # 'same': front = pad // 2, back = pad - front
        fronts = (pad_d // 2, pad_h // 2, pad_w // 2)
    backs = (pad_d - fronts[0], pad_h - fronts[1], pad_w - fronts[2])

    dt = x.dtype
    itemsize = jnp.dtype(dt).itemsize
    out_full_shape = (B, C, T + pad_d, H + pad_h, W + pad_w)

    # ---- canonical lane-dense view ------------------------------------------
    # Fold unpadded leading spatial axes into N and the unpadded trailing run
    # into one lane axis M.  Resulting view rank is 3 or 4.
    N = B * C
    dims = [[T, fronts[0], backs[0]], [H, fronts[1], backs[1]], [W, fronts[2], backs[2]]]
    while len(dims) > 2 and dims[0][1] == 0 and dims[0][2] == 0:
        N *= dims.pop(0)[0]
    trail = 1
    while len(dims) > 1 and dims[-1][1] == 0 and dims[-1][2] == 0:
        trail *= dims.pop()[0]
    if trail > 1 or len(dims) == 1:
        dims.append([max(trail, 1), 0, 0])

    in_dims = [d[0] for d in dims]
    out_dims = [d[0] + d[1] + d[2] for d in dims]
    pads = [(d[1], d[2]) for d in dims]
    nmid = len(dims) - 1                       # untiled middle axes
    view_in_shape = (N, *in_dims)
    view_out_shape = (N, *out_dims)

    in_row_bytes = math.prod(in_dims) * itemsize
    out_row_bytes = math.prod(out_dims) * itemsize
    row_bytes = in_row_bytes + out_row_bytes

    tile_budget, vmem_limit, num_tc = _hw_budget()

    # ---- block sizing (no ragged blocks) -------------------------------------
    lane_padded = pads[-1] != (0, 0)
    M = in_dims[-1]
    lane_blk = M
    n_blk = None

    max_rows = tile_budget // (2 * row_bytes)  # x2: double-buffered pipeline
    if max_rows >= 1:
        divisors = [d for d in range(1, min(N, max_rows) + 1) if N % d == 0]
        n_blk = divisors[-1]
        if num_tc >= 2 and N >= 2:
            # On the 2-TC chip prefer an even number of equal blocks so both
            # TensorCores get identical work under dimension_semantics=parallel.
            even = [d for d in divisors if (N // d) % 2 == 0]
            if even:
                n_blk = even[-1]
    elif not lane_padded:
        # A single (B*C) row exceeds the budget; tile the unpadded lane axis.
        n_blk = 1
        per_lane_bytes = row_bytes // M
        max_lanes = max(0, tile_budget // (2 * per_lane_bytes))
        cand = [m for m in range(128, M + 1, 128) if M % m == 0 and m <= max_lanes]
        lane_blk = cand[-1] if cand else None
        if lane_blk is None:
            n_blk = None

    if n_blk is None:
        # TODO(synk): row too large / lane axis padded and oversized for this
        # tiling scheme — fall back to XLA's pad (long term: fuse into the
        # consuming patch-embed conv kernel).
        return _xla_pad(x, fronts, backs)

    num_n = N // n_blk
    num_lane = M // lane_blk
    lane_out_blk = lane_blk if not lane_padded else out_dims[-1]

    in_block = (n_blk, *in_dims[:-1], lane_blk)
    out_block = (n_blk, *out_dims[:-1], lane_out_blk)

    def idx_map(i, j):
        return (i,) + (0,) * nmid + (j,)

    # ---- kernel: in-vreg zero pad, single lane-dense store --------------------
    def pad_kernel(x_ref, o_ref):
        v = x_ref[...]
        # Build zero padding in registers (VPU/XLU work; the store slot is the
        # bottleneck here).  Innermost (lane) axis first while the value is
        # smallest; all pad extents are compile-time constants.
        for ax in range(len(pads), 0, -1):
            f, b = pads[ax - 1]
            if f == 0 and b == 0:
                continue
            parts = []
            if f:
                s = list(v.shape)
                s[ax] = f
                parts.append(jnp.zeros(s, dt))
            parts.append(v)
            if b:
                s = list(v.shape)
                s[ax] = b
                parts.append(jnp.zeros(s, dt))
            v = jnp.concatenate(parts, axis=ax)
        o_ref[...] = v  # written exactly once, full-width

    in_bytes = N * math.prod(in_dims) * itemsize
    out_bytes = N * math.prod(out_dims) * itemsize
    cost = pl.CostEstimate(flops=0, transcendentals=0,
                           bytes_accessed=in_bytes + out_bytes)

    out = pl.pallas_call(
        pad_kernel,
        out_shape=jax.ShapeDtypeStruct(view_out_shape, dt),
        grid_spec=pl.GridSpec(
            grid=(num_n, num_lane),
            in_specs=[pl.BlockSpec(in_block, idx_map)],
            out_specs=pl.BlockSpec(out_block, idx_map),
        ),
        compiler_params=pltpu.CompilerParams(
            dimension_semantics=("parallel", "parallel"),
            vmem_limit_bytes=vmem_limit,
        ),
        cost_estimate=cost,
    )(x.reshape(view_in_shape))

    return out.reshape(out_full_shape)


# ---------------- pure-JAX reference (for the self-test) ----------------------
def _pad_reference(x, kernel_size, stride, dilation, padding):
    ks, st, dl = _to_3tuple(kernel_size), _to_3tuple(stride), _to_3tuple(dilation)
    T, H, W = x.shape[-3:]
    pd, ph, pw = _get_pad_shape((T, H, W), ks, st, dl)
    if pd == 0 and ph == 0 and pw == 0:
        return x
    if padding == "corner":
        cfg = ((0, 0), (0, 0), (0, pd), (0, ph), (0, pw))
    else:
        cfg = ((0, 0), (0, 0),
               (pd // 2, pd - pd // 2),
               (ph // 2, ph - ph // 2),
               (pw // 2, pw - pw // 2))
    return jnp.pad(x, cfg)


if __name__ == "__main__":
    key = jax.random.PRNGKey(0)
    # Small NCDHW input: B=2, C=4, T=3, H=15, W=17.
    x = jax.random.normal(key, (2, 4, 3, 15, 17), dtype=jnp.float32)

    cases = [
        (4, 4, 1, "corner"),                 # pads T/H/W -> rank-4 view
        (4, 4, 1, "same"),
        ((2, 1, 1), (2, 1, 1), 1, "corner"), # temporal-only -> lane-dense (N,T,H*W)
        ((1, 4, 4), (1, 4, 4), 1, "same"),   # spatial-only -> T folded into N
    ]
    for ks, st, dl, mode in cases:
        out = jax.block_until_ready(adaptive_padding(x, ks, st, dl, mode))
        ref = _pad_reference(x, ks, st, dl, mode)
        assert out.shape == ref.shape, (ks, mode, out.shape, ref.shape)
        assert jnp.array_equal(out, ref), (ks, mode)

    # Odd N (no even 2-TC split possible) still exact.
    x_odd = jax.random.normal(key, (3, 1, 3, 15, 17), dtype=jnp.float32)
    out = jax.block_until_ready(adaptive_padding(x_odd, 4, 4, 1, "corner"))
    assert jnp.array_equal(out, _pad_reference(x_odd, 4, 4, 1, "corner"))

    # Already divisible -> module returns x unchanged.
    x_div = jax.random.normal(key, (2, 4, 4, 16, 16), dtype=jnp.float32)
    out = jax.block_until_ready(adaptive_padding(x_div, 4, 4, 1, "corner"))
    assert out.shape == x_div.shape and jnp.array_equal(out, x_div)

    print("KERNEL_OK")
</pallas_src>

<mosaic_0001>
module attributes {stable_mosaic.version = 11 : i64} {
  func.func @pad_kernel(%arg0: i32, %arg1: i32, %arg2: memref<4x3x15x17xf32, #tpu.memory_space<vmem>>, %arg3: memref<4x4x16x20xf32, #tpu.memory_space<vmem>>) attributes {dimension_semantics = [#tpu.dimension_semantics<parallel>, #tpu.dimension_semantics<parallel>], iteration_bounds = array<i64: 2, 1>, scalar_prefetch = 0 : i64, scratch_operands = 0 : i64, tpu.core_type = #tpu.core_type<tc>, window_params = [{transform_indices = @transform_0, window_bounds = array<i64: 4, 3, 15, 17>}, {transform_indices = @transform_1, window_bounds = array<i64: 4, 4, 16, 20>}]} {
    %c0 = arith.constant 0 : index
    %c0_0 = arith.constant 0 : index
    %c0_1 = arith.constant 0 : index
    %c0_2 = arith.constant 0 : index
    %0 = vector.load %arg2[%c0, %c0_0, %c0_1, %c0_2] : memref<4x3x15x17xf32, #tpu.memory_space<vmem>>, vector<4x3x15x17xf32>
    %cst = arith.constant 0.000000e+00 : f32
    %1 = vector.broadcast %cst : f32 to vector<4x3x15x3xf32>
    %2 = tpu.concatenate %0, %1 in 3 : vector<4x3x15x17xf32>, vector<4x3x15x3xf32> -> vector<4x3x15x20xf32>
    %cst_3 = arith.constant 0.000000e+00 : f32
    %3 = vector.broadcast %cst_3 : f32 to vector<4x3x1x20xf32>
    %4 = tpu.concatenate %2, %3 in 2 : vector<4x3x15x20xf32>, vector<4x3x1x20xf32> -> vector<4x3x16x20xf32>
    %cst_4 = arith.constant 0.000000e+00 : f32
    %5 = vector.broadcast %cst_4 : f32 to vector<4x1x16x20xf32>
    %6 = tpu.concatenate %4, %5 in 1 : vector<4x3x16x20xf32>, vector<4x1x16x20xf32> -> vector<4x4x16x20xf32>
    %c0_5 = arith.constant 0 : index
    %c0_6 = arith.constant 0 : index
    %c0_7 = arith.constant 0 : index
    %c0_8 = arith.constant 0 : index
    %7 = vector.load %arg3[%c0_5, %c0_6, %c0_7, %c0_8] : memref<4x4x16x20xf32, #tpu.memory_space<vmem>>, vector<4x4x16x20xf32>
    tpu.vector_store %arg3[%c0_5, %c0_6, %c0_7, %c0_8], %6 {strides = array<i32>} : memref<4x4x16x20xf32, #tpu.memory_space<vmem>>, vector<4x4x16x20xf32>,
    return
  }
  func.func @transform_0(%arg0: i32, %arg1: i32) -> (i32, i32, i32, i32) {
    %c0_i32 = arith.constant 0 : i32
    %c0_i32_0 = arith.constant 0 : i32
    %c0_i32_1 = arith.constant 0 : i32
    return %arg0, %c0_i32, %c0_i32_0, %arg1 : i32, i32, i32, i32
  }
  func.func @transform_1(%arg0: i32, %arg1: i32) -> (i32, i32, i32, i32) {
    %c0_i32 = arith.constant 0 : i32
    %c0_i32_0 = arith.constant 0 : i32
    %c0_i32_1 = arith.constant 0 : i32
    return %arg0, %c0_i32, %c0_i32_0, %arg1 : i32, i32, i32, i32
  }
}

</mosaic_0001>

<bundles_post_ra>
// kernel: tpu_custom_call.1
= control target key start
LH: loop header
LB: loop body
LE: loop exit
PB: predicated region body
PF: predicated region fallthrough
CT: control target
= control target key end

     0   :  { %6 = vsyncpa [#allocation3], 0  ;;  %s734_s0 = inlined_call_operand.vmem [shape: f32[8,3,15,17], index: 0, kind: input, shape index: {}]   ;;  %s735_s1 = inlined_call_operand.hbm [shape: f32[8,4,16,20], index: 1, kind: output, shape index: {}]  }
   0x1   :  { %8 = vsyncpa [#allocation3 + $0x1], 0  ;;  %s505_s6 = smov 0   ;;  %s507_s7 = smov 0  }
   0x2   :  { %s509_s8 = smov 0   ;;  %s511_s9 = smov 0  }
   0x3   :  { %s513_s10 = smov 0   ;;  %s515_s11 = smov 0  }
   0x4 LB: > { %s337_s12 = sadd.s32 4294967295, %s490_s11   ;;  %s338_s13 = sadd.s32 4294967294, %s490_s11   ;;  %s490_s11 = sphi %s515_s11, %s14_s11   ;;  %s486_s10 = sphi %s513_s10, %s742_s10   ;;  %s482_s9 = sphi %s511_s9, %s741_s9   ;;  %s478_s8 = sphi %s509_s8, %s740_s8   ;;  %s474_s7 = sphi %s507_s7, %s739_s7   ;;  %s470_s6 = sphi %s505_s6, %s738_s6  }
   0x5   : > { %s26_s14 = sadd.s32 1, %s486_s10  ;;  %s63_s15 = sadd.s32 1, %s478_s8 }
   0x6   : > { %p28_p0 = scmp.ge.s32.totalorder %s26_s14, 2  ;;  %p73_p1 = scmp.ne.s32.totalorder %s478_s8, %s474_s7 }
   0x7   : > { %p74_p2 = scmp.eq.s32.totalorder %s337_s12, 1  ;;  %p79_p3 = scmp.ne.s32.totalorder %s474_s7, %s470_s6 }
   0x8   : > { %s744_s14 = smov (%p28_p0, %s26_s14), 0  ;;  %p80_p5 = scmp.eq.s32.totalorder %s338_s13, 1 }
   0x9   : > { %p545_p4 = por %p74_p2, %p73_p1  ;;  %s58_s17 = ssub.s32 %s486_s10, %s744_s14 }
   0xa   : > { %p341_p6 = scmp.ge.s32.totalorder %s490_s11, 1  ;;  %p61_p7 = scmp.eq.s32.totalorder %s58_s17, 0 }
   0xb   : > { %p552_p8 = por %p80_p5, %p79_p3  ;;  %p111_p9 = scmp.lt.s32.totalorder %s490_s11, 3 }
   0xc   : > { %s558_s19 = scalar_select %p61_p7, %s478_s8, %s63_s15  }
   0xd   : > { %p112_p10 = pnand %p341_p6, %p111_p9 }
   0xe   : > { %s132_s20 = sand.u32 (!%p112_p10), 1, %s474_s7   ;;  %s343_s21 = sshll.u32 (!%p112_p10), %s482_s9, 2 }
   0xf   : > { %115 = sbr.rel (%p112_p10) target bundleno = 56 (0x38), region = 24  ;;  %s342_s22 = sshll.u32 (!%p112_p10), %s132_s20, 8 }
  0x10   : > { %p136_p11 = scmp.lt.s32.totalorder (!%p112_p10), %s343_s21, 7  ;;  %s564_s23 = scalar_lea.vmem (!%p112_p10), [#allocation2], %s342_s22 }
  0x11   : > { %s352_s28 = sshll.u32 (!%p112_p10), %s482_s9, 8  ;;  %s256_s3 = sshll.u32 (!%p112_p10), %s564_s23, 4  ;;  %s257_s3 = int_to_ptr.vmem [resolvable:$true] %s256_s3 }
  0x12   : > { %s255_s2 = scalar_lea.hbm (!%p112_p10), %s735_s1, %s352_s28  ;;  %s242_s5 = scalar_lea.sflag (!%p112_p10), [#allocation3], %s132_s20 }
  0x13   : > { %s258_s4 = sshll.u32 (!%p112_p10), %s255_s2, 4  ;;  %s432_s17 = scalar_lea.hbm (!%p112_p10), %s735_s1, 512  ;;  %s259_s4 = int_to_ptr.hbm [resolvable:$true] %s258_s4 }
  0x14   : > { %vm208_vm0 = vcmask 162816   ;;  %s746_s21 = smov (!%p136_p11, %s343_s21), 7  ;;  %v492_v0 = vmov 0.0   ;;  %vm170_vm1 = vcmask 138240   ;;  %vm195_vm2 = vcmask 1046528   ;;  %s426_s9 = sshra.s32 %s259_s4, 4  ;;  %s427_s9 = int_to_ptr.hbm [resolvable:$true] %s426_s9 }
  0x15   : > { %215 = vst.msk [vmem:[%s564_s23 + $0x30] sm:$0xff] %vm208_vm0, %v492_v0  ;;  %s353_s24 = smul.u32 48, %s746_s21  ;;  %s428_s12 = scalar_lea.hbm %s427_s9, 256 }
  0x16   : > { %216 = vst.msk [vmem:[%s564_s23 + $0x38] sm:$0xff] %vm208_vm0, %v492_v0  ;;  %p429_p12 = scmp.ne.s32.totalorder %s427_s9, %s428_s12  ;;  %p433_p1 = scmp.lt.s32.totalorder %s427_s9, %s735_s1 }
  0x17   : > { %223 = vst.msk [vmem:[%s564_s23 + $0x70] sm:$0xff] %vm208_vm0, %v492_v0  ;;  %s577_s27 = scalar_lea.vmem %s734_s0, %s353_s24  ;;  %p434_p2 = scmp.lt.s32.totalorder %s432_s17, %s428_s12 }
  0x18   : > { %224 = vst.msk [vmem:[%s564_s23 + $0x78] sm:$0xff] %vm208_vm0, %v492_v0  ;;  %v146_v1 = vld [vmem:[%s577_s27] sm:$0xff]  ;;  %v147_v2 = vld [vmem:[%s577_s27 + $0x8] sm:$0x7f]  ;;  %v148_v3 = vld [vmem:[%s577_s27 + $0x10] sm:$0xff]  ;;  %p430_p13 = pnand %p429_p12, %p545_p4 }
  0x19   : > { %231 = vst.msk [vmem:[%s564_s23 + $0xb0] sm:$0xff] %vm208_vm0, %v492_v0  ;;  %v171_v4 = vsel %vm170_vm1, %v146_v1, 0.0  ;;  %v172_v5 = vsel %vm170_vm1, %v147_v2, 0.0  ;;  %v173_v6 = vsel %vm170_vm1, %v148_v3, 0.0  ;;  %v149_v7 = vld [vmem:[%s577_s27 + $0x18] sm:$0x7f]  ;;  %p435_p3 = por %p434_p2, %p433_p1 }
  0x1a   : > { %232 = vst.msk [vmem:[%s564_s23 + $0xb8] sm:$0xff] %vm208_vm0, %v492_v0  ;;  %v150_v8 = vld [vmem:[%s577_s27 + $0x20] sm:$0xff]  ;;  %v196_v9 = vsel %vm195_vm2, %v172_v5, 0.0  ;;  %v174_v10 = vsel %vm170_vm1, %v149_v7, 0.0  ;;  %v151_v11 = vld [vmem:[%s577_s27 + $0x28] sm:$0x7f]  ;;  %p431_p0 = pneg %p430_p13 }
  0x1b   : > { %209 = vst.msk [vmem:[%s564_s23] sm:$0xff] %vm208_vm0, %v171_v4  ;;  %v197_v12 = vsel %vm195_vm2, %v174_v10, 0.0  ;;  %v175_v13 = vsel %vm170_vm1, %v150_v8, 0.0  ;;  %v176_v14 = vsel %vm170_vm1, %v151_v11, 0.0  ;;  %v153_v15 = vld [vmem:[%s577_s27 + $0x38] sm:$0x7f] }
  0x1c   : > { %210 = vst.msk [vmem:[%s564_s23 + $0x8] sm:$0xff] %vm208_vm0, %v196_v9  ;;  %v198_v16 = vsel %vm195_vm2, %v176_v14, 0.0  ;;  %v152_v17 = vld [vmem:[%s577_s27 + $0x30] sm:$0xff]  ;;  %v178_v18 = vsel %vm170_vm1, %v153_v15, 0.0  ;;  %v155_v19 = vld [vmem:[%s577_s27 + $0x48] sm:$0x7f]  ;;  %p436_p5 = pnand %p435_p3, %p431_p0 }
  0x1d   : > { %211 = vst.msk [vmem:[%s564_s23 + $0x10] sm:$0xff] %vm208_vm0, %v173_v6  ;;  %v154_v20 = vld [vmem:[%s577_s27 + $0x40] sm:$0xff]  ;;  %v157_v21 = vld [vmem:[%s577_s27 + $0x58] sm:$0x7f]  ;;  %v177_v22 = vsel %vm170_vm1, %v152_v17, 0.0  ;;  %v180_v23 = vsel %vm170_vm1, %v155_v19, 0.0 }
  0x1e   : > { %212 = vst.msk [vmem:[%s564_s23 + $0x18] sm:$0xff] %vm208_vm0, %v197_v12  ;;  %v199_v24 = vsel %vm195_vm2, %v178_v18, 0.0  ;;  %v156_v25 = vld [vmem:[%s577_s27 + $0x50] sm:$0xff]  ;;  %v159_v26 = vld [vmem:[%s577_s27 + $0x68] sm:$0x7f]  ;;  %v179_v27 = vsel %vm170_vm1, %v154_v20, 0.0 }
  0x1f   : > { %213 = vst.msk [vmem:[%s564_s23 + $0x20] sm:$0xff] %vm208_vm0, %v175_v13  ;;  %v182_v28 = vsel %vm170_vm1, %v157_v21, 0.0  ;;  %v200_v29 = vsel %vm195_vm2, %v180_v23, 0.0  ;;  %v158_v30 = vld [vmem:[%s577_s27 + $0x60] sm:$0xff]  ;;  %v161_v31 = vld [vmem:[%s577_s27 + $0x78] sm:$0x7f] }
  0x20   : > { %214 = vst.msk [vmem:[%s564_s23 + $0x28] sm:$0xff] %vm208_vm0, %v198_v16  ;;  %v181_v32 = vsel %vm170_vm1, %v156_v25, 0.0  ;;  %v184_v33 = vsel %vm170_vm1, %v159_v26, 0.0  ;;  %v201_v34 = vsel %vm195_vm2, %v182_v28, 0.0  ;;  %v160_v35 = vld [vmem:[%s577_s27 + $0x70] sm:$0xff]  ;;  %v183_v37 = vsel %vm170_vm1, %v158_v30, 0.0 }
  0x21   : > { %239 = vst.msk [vmem:[%s564_s23 + $0xf0] sm:$0xff] %vm208_vm0, %v492_v0  ;;  %v163_v36 = vld [vmem:[%s577_s27 + $0x88] sm:$0x7f]  ;;  %v186_v38 = vsel %vm170_vm1, %v161_v31, 0.0  ;;  %v202_v39 = vsel %vm195_vm2, %v184_v33, 0.0  ;;  %v162_v40 = vld [vmem:[%s577_s27 + $0x80] sm:$0xff] }
  0x22   : > { %240 = vst.msk [vmem:[%s564_s23 + $0xf8] sm:$0xff] %vm208_vm0, %v492_v0  ;;  %v165_v41 = vld [vmem:[%s577_s27 + $0x98] sm:$0x7f]  ;;  %v185_v42 = vsel %vm170_vm1, %v160_v35, 0.0  ;;  %v188_v43 = vsel %vm170_vm1, %v163_v36, 0.0  ;;  %v203_v44 = vsel %vm195_vm2, %v186_v38, 0.0 }
  0x23   : > { %217 = vst.msk [vmem:[%s564_s23 + $0x40] sm:$0xff] %vm208_vm0, %v177_v22  ;;  %v164_v45 = vld [vmem:[%s577_s27 + $0x90] sm:$0xff]  ;;  %v167_v46 = vld [vmem:[%s577_s27 + $0xa8] sm:$0x7f]  ;;  %v187_v47 = vsel %vm170_vm1, %v162_v40, 0.0  ;;  %v190_v48 = vsel %vm170_vm1, %v165_v41, 0.0 }
  0x24   : > { %218 = vst.msk [vmem:[%s564_s23 + $0x48] sm:$0xff] %vm208_vm0, %v199_v24  ;;  %v204_v49 = vsel %vm195_vm2, %v188_v43, 0.0  ;;  %v166_v50 = vld [vmem:[%s577_s27 + $0xa0] sm:$0xff]  ;;  %v169_v51 = vld [vmem:[%s577_s27 + $0xb8] sm:$0x7f]  ;;  %v189_v52 = vsel %vm170_vm1, %v164_v45, 0.0 }
  0x25   : > { %219 = vst.msk [vmem:[%s564_s23 + $0x50] sm:$0xff] %vm208_vm0, %v179_v27  ;;  %v192_v53 = vsel %vm170_vm1, %v167_v46, 0.0  ;;  %v205_v54 = vsel %vm195_vm2, %v190_v48, 0.0  ;;  %v168_v55 = vld [vmem:[%s577_s27 + $0xb0] sm:$0xff]  ;;  %v191_v56 = vsel %vm170_vm1, %v166_v50, 0.0  ;;  %v194_v57 = vsel %vm170_vm1, %v169_v51, 0.0 }
  0x26   : > { %220 = vst.msk [vmem:[%s564_s23 + $0x58] sm:$0xff] %vm208_vm0, %v200_v29  ;;  %v206_v58 = vsel %vm195_vm2, %v192_v53, 0.0  ;;  %v193_v59 = vsel %vm170_vm1, %v168_v55, 0.0  ;;  %v207_v60 = vsel %vm195_vm2, %v194_v57, 0.0 }
  0x27   : > { %221 = vst.msk [vmem:[%s564_s23 + $0x60] sm:$0xff] %vm208_vm0, %v181_v32 }
  0x28   : > { %222 = vst.msk [vmem:[%s564_s23 + $0x68] sm:$0xff] %vm208_vm0, %v201_v34 }
  0x29   : > { %225 = vst.msk [vmem:[%s564_s23 + $0x80] sm:$0xff] %vm208_vm0, %v183_v37 }
  0x2a   : > { %226 = vst.msk [vmem:[%s564_s23 + $0x88] sm:$0xff] %vm208_vm0, %v202_v39 }
  0x2b   : > { %227 = vst.msk [vmem:[%s564_s23 + $0x90] sm:$0xff] %vm208_vm0, %v185_v42 }
  0x2c   : > { %228 = vst.msk [vmem:[%s564_s23 + $0x98] sm:$0xff] %vm208_vm0, %v203_v44 }
  0x2d   : > { %229 = vst.msk [vmem:[%s564_s23 + $0xa0] sm:$0xff] %vm208_vm0, %v187_v47 }
  0x2e   : > { %230 = vst.msk [vmem:[%s564_s23 + $0xa8] sm:$0xff] %vm208_vm0, %v204_v49 }
  0x2f   : > { %233 = vst.msk [vmem:[%s564_s23 + $0xc0] sm:$0xff] %vm208_vm0, %v189_v52 }
  0x30   : > { %234 = vst.msk [vmem:[%s564_s23 + $0xc8] sm:$0xff] %vm208_vm0, %v205_v54 }
  0x31   : > { %235 = vst.msk [vmem:[%s564_s23 + $0xd0] sm:$0xff] %vm208_vm0, %v191_v56 }
  0x32   : > { %236 = vst.msk [vmem:[%s564_s23 + $0xd8] sm:$0xff] %vm208_vm0, %v206_v58 }
  0x33   : > { %237 = vst.msk [vmem:[%s564_s23 + $0xe0] sm:$0xff] %vm208_vm0, %v193_v59 }
  0x34   : > { %238 = vst.msk [vmem:[%s564_s23 + $0xe8] sm:$0xff] %vm208_vm0, %v207_v60 }
  0x35   : > { %439 = shalt.err (!%p436_p5)
}
  0x36   : > { %s493_s20 = smov 128   ;;  %s494_s23 = smov 8  }
  0x37   : > { %354 = dma.vmem_to_hbm [thread:$0]  (%p545_p4), %s257_s3, 4096, %s259_s4, %s242_s5, %s493_s20, %s493_s20, %s494_s23  }
  0x38 PF: > { %p360_p6 = scmp.ge.s32.totalorder %s490_s11, 2  ;;  %s273_s24 = sand.u32 1, %s470_s6  }
  0x39   : > { %s274_s25 = scalar_lea.sflag [#allocation3], %s273_s24 }
  0x3a   : > { %p357_p7 = pnand %p360_p6, %p552_p8 }
  0x3c   : > { %p358_p9 = pneg %p357_p7 }
  0x3e   : > { %465 = dma.done.wait (%p358_p9), %s274_s25, 4096  }
  0x3f   : > { %467 = vsyncadd (%p358_p9), %s274_s25, 4294963200  ;;  %s14_s11 = sadd.s32 1, %s490_s11   ;;  %s738_s6 = smov %s474_s7 }
  0x40   : > { %p11_p10 = scmp.ge.s32.totalorder %s14_s11, 4   ;;  %s739_s7 = smov %s478_s8 }
  0x41   : > { %s740_s8 = smov %s558_s19  ;;  %s741_s9 = smov %s486_s10 }
  0x42   : > { %s742_s10 = smov %s744_s14  ;;  %13 = sbr.rel (!%p11_p10) target bundleno = 4 (0x4), region = 59 }
  0x47   :  { %280 = vsyncpa [#allocation3], 1 }
  0x48   :  { %282 = vsyncpa [#allocation3 + $0x1], 1 }

</bundles_post_ra>
